<compile_context>
chip_gen: v5e
topology: v5e:2x2
jax: 0.10.0
libtpu: 0.0.40
codegen_flags: <defaults>
</compile_context>

<pallas_src>
import functools

import jax
import jax.numpy as jnp
from jax.experimental import pallas as pl
from jax.experimental.pallas import tpu as pltpu


def _round_down_to_multiple(x, m):
    return max(m, (x // m) * m)


# ----------------------------------------------------------------------------
# Kernel 1: fused FlipLR (reverse W) + (x - 127) / 127 normalization.
# Row view (B*C*H, W); flip = (rows_tile, W) @ (W, W) anti-identity on the MXU.
# ----------------------------------------------------------------------------
def _flip_norm_kernel(x_ref, p_ref, flip_ref, norm_ref):
    x = x_ref[...]                                            # (rows_tile, W)
    p = p_ref[...]                                            # (W, W) 0/1 anti-identity
    # precision=HIGHEST keeps the permutation exact for f32 frame values
    # (default TPU dot precision could truncate operands to a single bf16 pass).
    flipped = jnp.dot(x, p, preferred_element_type=jnp.float32,
                      precision=jax.lax.Precision.HIGHEST)
    flip_ref[...] = flipped.astype(flip_ref.dtype)
    norm_ref[...] = ((flipped - 127.0) * (1.0 / 127.0)).astype(norm_ref.dtype)


@jax.jit
def flip_and_normalize(frames):
    """frames: (B, C, H, W) f32 -> (flipped frames, (flipped - 127) / 127)."""
    B, C, H, W = frames.shape
    rows = B * C * H
    x = frames.reshape(rows, W)

    # (W, W) anti-identity permutation: P[r, c] = 1 iff r + c == W - 1.
    r = jax.lax.broadcasted_iota(jnp.int32, (W, W), 0)
    c = jax.lax.broadcasted_iota(jnp.int32, (W, W), 1)
    p = (r + c == (W - 1)).astype(jnp.float32)

    # Row tile: ~512 KiB per input buffer (fits v5e's 16 MiB scoped VMEM with
    # 2x input + 2x2 output double buffers), multiple of 8 or the full extent.
    target_rows = max(8, (512 * 1024) // (W * 4))
    if target_rows >= rows:
        rows_tile = rows
    else:
        rows_tile = _round_down_to_multiple(target_rows, 8)
    grid = (pl.cdiv(rows, rows_tile),)

    flip_flat, norm_flat = pl.pallas_call(
        _flip_norm_kernel,
        grid=grid,
        in_specs=[
            pl.BlockSpec((rows_tile, W), lambda i: (i, 0)),
            pl.BlockSpec((W, W), lambda i: (0, 0)),
        ],
        out_specs=(
            pl.BlockSpec((rows_tile, W), lambda i: (i, 0)),
            pl.BlockSpec((rows_tile, W), lambda i: (i, 0)),
        ),
        out_shape=(
            jax.ShapeDtypeStruct((rows, W), jnp.float32),
            jax.ShapeDtypeStruct((rows, W), jnp.float32),
        ),
        input_output_aliases={0: 0},  # flipped frames reuse the input HBM slab
        compiler_params=pltpu.CompilerParams(
            dimension_semantics=("parallel",)),
    )(x, p)
    return flip_flat.reshape(B, C, H, W), norm_flat.reshape(B, C, H, W)


# ----------------------------------------------------------------------------
# Kernel 2: (frames - 127) / 127 only (non-augmented path), lane-dense slab,
# gridded over the H*W column axis in multiples of 128.
# ----------------------------------------------------------------------------
def _normalize_kernel(x_ref, o_ref):
    o_ref[...] = (x_ref[...] - 127.0) * (1.0 / 127.0)


@jax.jit
def normalize_frames(frames):
    B, C, H, W = frames.shape
    R, Ccols = B * C, H * W
    x = frames.reshape(R, Ccols)

    target_cols = max(128, ((512 * 1024) // (R * 4) // 128) * 128)
    cols_tile = Ccols if target_cols >= Ccols else target_cols
    grid = (pl.cdiv(Ccols, cols_tile),)

    out = pl.pallas_call(
        _normalize_kernel,
        grid=grid,
        in_specs=[pl.BlockSpec((R, cols_tile), lambda i: (0, i))],
        out_specs=pl.BlockSpec((R, cols_tile), lambda i: (0, i)),
        out_shape=jax.ShapeDtypeStruct((R, Ccols), jnp.float32),
        compiler_params=pltpu.CompilerParams(
            dimension_semantics=("parallel",)),
    )(x)
    return out.reshape(B, C, H, W)


# ----------------------------------------------------------------------------
# Kernel 3: inv_depth_mean_ten = mean(inv_depth) * 0.1 ; depth / mean_ten
# Scalar goes to SMEM; the divide is hoisted to one scalar reciprocal.
# ----------------------------------------------------------------------------
def _depth_norm_kernel(d_ref, o_ref, mean_ref):
    d = d_ref[...]                                            # (N, H*W)
    mean_ten = jnp.mean(d) * 0.1
    mean_ref[0] = mean_ten                                    # scalar -> SMEM
    # No zero-guard, mirroring the original PyTorch module.
    inv_mean = 1.0 / mean_ten                                 # hoisted reciprocal
    o_ref[...] = d * inv_mean


@jax.jit
def depth_mean_normalize(inv_depth):
    """inv_depth: (N, H, W) -> (inv_depth / (mean*0.1), (1,) scalar mean*0.1)."""
    N, H, W = inv_depth.shape
    d = inv_depth.reshape(N, H * W)                           # lane-dense
    out, mean_ten = pl.pallas_call(
        _depth_norm_kernel,
        out_shape=(
            jax.ShapeDtypeStruct((N, H * W), jnp.float32),
            jax.ShapeDtypeStruct((1,), jnp.float32),
        ),
        in_specs=[pl.BlockSpec(memory_space=pltpu.MemorySpace.VMEM)],
        out_specs=(
            pl.BlockSpec(memory_space=pltpu.MemorySpace.VMEM),
            pl.BlockSpec(memory_space=pltpu.MemorySpace.SMEM),
        ),
    )(d)
    return out.reshape(N, H, W), mean_ten


# ----------------------------------------------------------------------------
# Module wrapper (glue in plain JAX)
# ----------------------------------------------------------------------------
class FinetuneKernelPallas:
    """Pallas port of finetuneKernel (the parts fully specified by the source)."""

    def __init__(self, imgSize=(16, 16), smoothTerm="lap"):
        self.imgSize = tuple(imgSize)
        self.smoothTerm = smoothTerm

    def forward(self, frames, camparams, refIdx, S=0.5, do_data_augment=True,
                flip_coin=True, depth_key=None):
        assert frames.shape[0] == 1 and frames.ndim == 5
        frames = frames[0]                       # (bundle, C, H, W)
        camparams = camparams[0]                 # (6,)

        # Deterministic stand-in for `np.random.rand() > 0.5` data augmentation.
        if do_data_augment and flip_coin:
            # Fused: flip + normalized-for-network copies in one kernel launch.
            frames, frames_norm = flip_and_normalize(frames)
            camparams = camparams.at[2].set(self.imgSize[1] - camparams[2])
        else:
            frames_norm = normalize_frames(frames)

        bundle_size = frames.shape[0]
        src_frame_idx = jnp.array(
            tuple(range(0, refIdx)) + tuple(range(refIdx + 1, bundle_size)))

        ref_frame = frames[refIdx]               # analogue of ref_frame_pyramid[0]
        src_frames = frames[src_frame_idx]

        # TODO(synk): VggDepthEstimator / PoseNet / DirectVO / ImagePyramidLayer
        # class definitions were not provided; the inverse depth below is a
        # deterministic placeholder so the specified mean-normalization math can
        # still be exercised.
        if depth_key is None:
            depth_key = jax.random.PRNGKey(1)
        inv_depth0 = jax.random.uniform(
            depth_key, (bundle_size,) + self.imgSize, jnp.float32, 0.1, 1.0)
        inv_depth_norm, inv_depth_mean_ten = depth_mean_normalize(inv_depth0)

        ref_inv_depth = inv_depth_norm[refIdx]
        src_inv_depth = inv_depth_norm[src_frame_idx]

        # TODO(synk): photometric_cost / smoothness_cost / pose iteration require
        # DirectVO internals (warping, SSIM, smoothness) which are not provided.

        return {
            "frames_aug": frames,
            "camparams": camparams,
            "frames_norm": frames_norm,
            "ref_frame": ref_frame,
            "src_frames": src_frames,
            "inv_depth_mean_ten": inv_depth_mean_ten,
            "ref_inv_depth_times_mean": ref_inv_depth * inv_depth_mean_ten[0],
            "src_inv_depth": src_inv_depth,
        }


# ----------------------------------------------------------------------------
if __name__ == "__main__":
    key = jax.random.PRNGKey(0)
    k_frames, k_depth = jax.random.split(key, 2)

    imgSize = (16, 16)                 # small shapes for the synthetic test
    bundle, C, H, W = 3, 3, imgSize[0], imgSize[1]

    frames = jax.random.uniform(
        k_frames, (1, bundle, C, H, W), jnp.float32, 0.0, 255.0)
    camparams = jnp.array([[100.0, 0.0, 8.0, 0.0, 100.0, 8.0]], jnp.float32)

    model = FinetuneKernelPallas(imgSize=imgSize)

    # ---- augmented (flip) path: exercises the fused flip+normalize kernel ----
    outs = model.forward(frames, camparams, refIdx=1,
                         do_data_augment=True, flip_coin=True,
                         depth_key=k_depth)
    jax.tree_util.tree_map(jax.block_until_ready, outs)

    flip_ref = frames[0][..., ::-1]
    assert jnp.allclose(outs["frames_aug"], flip_ref, atol=1e-5)
    assert jnp.allclose(outs["frames_norm"], (flip_ref - 127.0) / 127.0, atol=1e-5)
    assert bool(outs["camparams"][2] == imgSize[1] - camparams[0, 2])

    # Depth mean-normalization reference (placeholder depth is deterministic).
    inv_depth0_ref = jax.random.uniform(
        k_depth, (bundle,) + imgSize, jnp.float32, 0.1, 1.0)
    mean_ten_ref = jnp.mean(inv_depth0_ref) * 0.1
    assert jnp.allclose(outs["inv_depth_mean_ten"][0], mean_ten_ref, rtol=1e-4)
    assert jnp.allclose(outs["src_inv_depth"],
                        (inv_depth0_ref / mean_ten_ref)[jnp.array([0, 2])],
                        rtol=1e-4)
    assert jnp.isfinite(outs["ref_inv_depth_times_mean"]).all()

    # ---- non-augmented path: exercises the normalize-only kernel ----
    outs_nf = model.forward(frames, camparams, refIdx=1,
                            do_data_augment=False, flip_coin=False,
                            depth_key=k_depth)
    jax.tree_util.tree_map(jax.block_until_ready, outs_nf)
    assert jnp.allclose(outs_nf["frames_norm"],
                        (frames[0] - 127.0) / 127.0, atol=1e-5)

    print("KERNEL_OK")
</pallas_src>

<mosaic_0001>
module attributes {stable_mosaic.version = 11 : i64} {
  func.func @_flip_norm_kernel(%arg0: i32, %arg1: memref<144x16xf32, #tpu.memory_space<vmem>>, %arg2: memref<16x16xf32, #tpu.memory_space<vmem>>, %arg3: memref<144x16xf32, #tpu.memory_space<vmem>>, %arg4: memref<144x16xf32, #tpu.memory_space<vmem>>) attributes {dimension_semantics = [#tpu.dimension_semantics<parallel>], iteration_bounds = array<i64: 1>, scalar_prefetch = 0 : i64, scratch_operands = 0 : i64, tpu.core_type = #tpu.core_type<tc>, window_params = [{transform_indices = @transform_0, window_bounds = array<i64: 144, 16>}, {pipeline_mode = #tpu.pipeline_mode<synchronous>, transform_indices = @transform_1, window_bounds = array<i64: 16, 16>}, {transform_indices = @transform_2, window_bounds = array<i64: 144, 16>}, {transform_indices = @transform_3, window_bounds = array<i64: 144, 16>}]} {
    %c0 = arith.constant 0 : index
    %c0_0 = arith.constant 0 : index
    %0 = vector.load %arg1[%c0, %c0_0] : memref<144x16xf32, #tpu.memory_space<vmem>>, vector<144x16xf32>
    %c0_1 = arith.constant 0 : index
    %c0_2 = arith.constant 0 : index
    %1 = vector.load %arg2[%c0_1, %c0_2] : memref<16x16xf32, #tpu.memory_space<vmem>>, vector<16x16xf32>
    %cst = arith.constant dense<0.000000e+00> : vector<144x16xf32>
    %2 = tpu.matmul %0, %1, %cst {dimension_numbers = #tpu.dot_dimension_numbers<[1], [0], [0], [1], [0, 0, 1, 1], [], []>, precision = #tpu.contract_precision<fp32>} : vector<144x16xf32>, vector<16x16xf32>, vector<144x16xf32> -> vector<144x16xf32>
    %c0_3 = arith.constant 0 : index
    %c0_4 = arith.constant 0 : index
    %3 = vector.load %arg3[%c0_3, %c0_4] : memref<144x16xf32, #tpu.memory_space<vmem>>, vector<144x16xf32>
    tpu.vector_store %arg3[%c0_3, %c0_4], %2 {strides = array<i32>} : memref<144x16xf32, #tpu.memory_space<vmem>>, vector<144x16xf32>,
    %cst_5 = arith.constant 1.270000e+02 : f32
    %4 = vector.broadcast %cst_5 : f32 to vector<144x16xf32>
    %5 = arith.subf %2, %4 : vector<144x16xf32>
    %cst_6 = arith.constant 0.00787401571 : f32
    %6 = vector.broadcast %cst_6 : f32 to vector<144x16xf32>
    %7 = arith.mulf %5, %6 : vector<144x16xf32>
    %c0_7 = arith.constant 0 : index
    %c0_8 = arith.constant 0 : index
    %8 = vector.load %arg4[%c0_7, %c0_8] : memref<144x16xf32, #tpu.memory_space<vmem>>, vector<144x16xf32>
    tpu.vector_store %arg4[%c0_7, %c0_8], %7 {strides = array<i32>} : memref<144x16xf32, #tpu.memory_space<vmem>>, vector<144x16xf32>,
    return
  }
  func.func @transform_0(%arg0: i32) -> (i32, i32) {
    %c0_i32 = arith.constant 0 : i32
    %c0_i32_0 = arith.constant 0 : i32
    return %arg0, %c0_i32 : i32, i32
  }
  func.func @transform_1(%arg0: i32) -> (i32, i32) {
    %c0_i32 = arith.constant 0 : i32
    %c0_i32_0 = arith.constant 0 : i32
    %c0_i32_1 = arith.constant 0 : i32
    return %c0_i32, %c0_i32_0 : i32, i32
  }
  func.func @transform_2(%arg0: i32) -> (i32, i32) {
    %c0_i32 = arith.constant 0 : i32
    %c0_i32_0 = arith.constant 0 : i32
    return %arg0, %c0_i32 : i32, i32
  }
  func.func @transform_3(%arg0: i32) -> (i32, i32) {
    %c0_i32 = arith.constant 0 : i32
    %c0_i32_0 = arith.constant 0 : i32
    return %arg0, %c0_i32 : i32, i32
  }
}

</mosaic_0001>

<bundles_post_ra>
// kernel: flip_and_normalize.1
= control target key start
LH: loop header
LB: loop body
LE: loop exit
PB: predicated region body
PF: predicated region fallthrough
CT: control target
= control target key end

     0   :  { %vm34_vm0 = vcmask 130048   ;;  %s1439_s0 = inlined_call_operand.vmem [shape: f32[144,16], index: 0, kind: input, shape index: {}, may-alias: {0,2}]   ;;  %s1440_s1 = inlined_call_operand.vmem [shape: f32[16,16], index: 1, kind: input, shape index: {}]   ;;  %s1441_s2 = inlined_call_operand.vmem [shape: f32[144,16], index: 2, kind: output, shape index: {0}, may-alias: {0,2}]   ;;  %s1442_s3 = inlined_call_operand.hbm [shape: f32[144,16], index: 3, kind: output, shape index: {1}]  }
   0x1   :  { %v33_v0 = vld [vmem:[%s1440_s1 + $0x8] sm:$0xff]  ;;  %v32_v1 = vld [vmem:[%s1440_s1] sm:$0xff]  ;;  %v24_v6 = vld [vmem:[%s1439_s0 + $0x50] sm:$0xff] }
   0x2   :  { %v23_v2 = vld [vmem:[%s1439_s0 + $0x48] sm:$0xff]  ;;  %v952_v3 = vand.u32 4294901760, %v33_v0  ;;  %v954_v4 = vand.u32 4294901760, %v32_v1  ;;  %v14_v7 = vld [vmem:[%s1439_s0] sm:$0xff]  ;;  %v25_v8 = vld [vmem:[%s1439_s0 + $0x58] sm:$0xff]  ;;  %v66_v10 = vsel %vm34_vm0, %v24_v6, 0 }
   0x3   :  { %v63_v5 = vsel %vm34_vm0, %v23_v2, 0  ;;  %v36_v11 = vsel %vm34_vm0, %v14_v7, 0  ;;  %v15_v12 = vld [vmem:[%s1439_s0 + $0x8] sm:$0xff]  ;;  %v977_v15 = vand.u32 4294901760, %v66_v10  ;;  %v69_v18 = vsel %vm34_vm0, %v25_v8, 0 }
   0x4   :  { %v966_v9 = vand.u32 4294901760, %v63_v5  ;;  %887 = vmatpush.msra.mxu2 %v952_v3  ;;  %v267_v13 = vsub.f32 %v33_v0, %v952_v3  ;;  %v273_v14 = vsub.f32 %v32_v1, %v954_v4  ;;  %104 = vmatpush.msra.mxu0 %v952_v3  ;;  %v979_v16 = vand.u32 4294901760, %v36_v11 }
   0x5   :  { %v39_v19 = vsel %vm34_vm0, %v15_v12, 0 }
   0x6   :  { %v982_v17 = vsub.f32 %v63_v5, %v966_v9 }
   0x7   :  { %9 = vsyncpa [#allocation3], 0  ;;  %888 = vmatpush.msra.mxu2 %v954_v4  ;;  %v268_v20 = vand.u32 4294901760, %v267_v13  ;;  %v274_v21 = vand.u32 4294901760, %v273_v14  ;;  %v988_v22 = vsub.f32 %v66_v10, %v977_v15  ;;  %106 = vmatpush.msra.mxu0 %v954_v4  ;;  %v992_v23 = vsub.f32 %v36_v11, %v979_v16  ;;  %v16_v33 = vld [vmem:[%s1439_s0 + $0x10] sm:$0xff]  ;;  %v26_v39 = vld [vmem:[%s1439_s0 + $0x60] sm:$0xff] }
   0x8   :  { %v181_v24 = vand.u32 4294901760, %v982_v17  ;;  %v995_v25 = vand.u32 4294901760, %v39_v19  ;;  %v1002_v31 = vand.u32 4294901760, %v69_v18  ;;  %v42_v41 = vsel %vm34_vm0, %v16_v33, 0  ;;  %v17_v45 = vld [vmem:[%s1439_s0 + $0x18] sm:$0xff]  ;;  %v27_v55 = vld [vmem:[%s1439_s0 + $0x68] sm:$0xff] }
   0x9   :  { %367 = vmatpush.msrb.mxu2 %v267_v13  ;;  %v269_v26 = vsub.f32 %v267_v13, %v268_v20  ;;  %v275_v27 = vsub.f32 %v273_v14, %v274_v21  ;;  %v109_v28 = vand.u32 4294901760, %v992_v23  ;;  %606 = vmatpush.msrb.mxu0 %v268_v20  ;;  %v189_v30 = vand.u32 4294901760, %v988_v22  ;;  %v18_v59 = vld [vmem:[%s1439_s0 + $0x20] sm:$0xff]  ;;  %v28_v5 = vld [vmem:[%s1439_s0 + $0x70] sm:$0xff]  ;;  %v19_v10 = vld [vmem:[%s1439_s0 + $0x28] sm:$0xff]  ;;  %s920_s27 = smov [#allocation2]  }
   0xa   :  { %v182_v29 = vsub.f32 %v982_v17, %v181_v24  ;;  %v1005_v32 = vsub.f32 %v39_v19, %v995_v25  ;;  %v1022_v43 = vsub.f32 %v69_v18, %v1002_v31  ;;  %v1024_v44 = vand.u32 4294901760, %v42_v41  ;;  %s853_s28 = sshll.u32 %s920_s27, 4  ;;  %s855_s4 = sshll.u32 %s1442_s3, 4  ;;  %s854_s28 = int_to_ptr.vmem [resolvable:$true] %s853_s28  ;;  %s856_s4 = int_to_ptr.hbm [resolvable:$true] %s855_s4 }
   0xb   :  { %370 = vmatpush.msrb.mxu2 %v273_v14  ;;  %v270_v34 = vand.u32 4294901760, %v269_v26  ;;  %v276_v35 = vand.u32 4294901760, %v275_v27  ;;  %v110_v36 = vsub.f32 %v992_v23, %v109_v28  ;;  %610 = vmatpush.msrb.mxu0 %v274_v21  ;;  %v190_v42 = vsub.f32 %v988_v22, %v189_v30  ;;  %v29_v27 = vld [vmem:[%s1439_s0 + $0x78] sm:$0xff]  ;;  %s921_s7 = smov 128   ;;  %s922_s8 = smov 8  }
   0xc   :  { %v183_v37 = vand.u32 4294901760, %v182_v29  ;;  %v117_v38 = vand.u32 4294901760, %v1005_v32  ;;  %v72_v46 = vsel %vm34_vm0, %v26_v39, 0  ;;  %v1035_v48 = vsub.f32 %v42_v41, %v1024_v44 }
   0xd   :  { %889 = vmatpush.msra.mxu3 %v270_v34  ;;  %271 = vmatpush.msra.mxu1 %v270_v34  ;;  %v111_v40 = vand.u32 4294901760, %v110_v36  ;;  %v45_v49 = vsel %vm34_vm0, %v17_v45, 0  ;;  %v191_v50 = vand.u32 4294901760, %v190_v42  ;;  %v197_v51 = vand.u32 4294901760, %v1022_v43 }
   0xe   :  { %184 = vmatmul.f32.vlgmr.msra.gmra.mxu2 %v183_v37  ;;  %v118_v47 = vsub.f32 %v1005_v32, %v117_v38  ;;  %v1042_v52 = vand.u32 4294901760, %v72_v46  ;;  %v125_v54 = vand.u32 4294901760, %v1035_v48  ;;  %v1049_v56 = vand.u32 4294901760, %v45_v49 }
   0xf   :  { %890 = vmatpush.msra.mxu3 %v276_v35  ;;  %277 = vmatpush.msra.mxu1 %v276_v35  ;;  %v198_v57 = vsub.f32 %v1022_v43, %v197_v51  ;;  %v75_v60 = vsel %vm34_vm0, %v27_v55, 0  ;;  %v48_v63 = vsel %vm34_vm0, %v18_v59, 0  ;;  %v78_v11 = vsel %vm34_vm0, %v28_v5, 0  ;;  %v20_v35 = vld [vmem:[%s1439_s0 + $0x30] sm:$0xff] }
  0x10   :  { %315 = vmatmul.f32.vlgmr.msra.gmra.mxu3 %v966_v9  ;;  %112 = vmatmul.f32.vlgmr.msra.gmra.mxu0 %v111_v40  ;;  %v119_v53 = vand.u32 4294901760, %v118_v47  ;;  %v1056_v58 = vsub.f32 %v72_v46, %v1042_v52  ;;  %v126_v61 = vsub.f32 %v1035_v48, %v125_v54  ;;  %v1067_v62 = vsub.f32 %v45_v49, %v1049_v56  ;;  %v30_v49 = vld [vmem:[%s1439_s0 + $0x80] sm:$0xff] }
  0x11   :  { %477 = vmatpush.msrb.mxu3 %v952_v3  ;;  %279 = vmatmul.f32.vlgmr.msra.gmra.mxu1 %v979_v16  ;;  %v199_v0 = vand.u32 4294901760, %v198_v57  ;;  %v1072_v2 = vand.u32 4294901760, %v75_v60  ;;  %v1078_v6 = vand.u32 4294901760, %v48_v63  ;;  %v51_v14 = vsel %vm34_vm0, %v19_v10, 0  ;;  %v21_v57 = vld [vmem:[%s1439_s0 + $0x38] sm:$0xff] }
  0x12   :  { %699 = vmatpush.msrb.mxu1 %v952_v3  ;;  %v205_v1 = vand.u32 4294901760, %v1056_v58  ;;  %v127_v3 = vand.u32 4294901760, %v126_v61  ;;  %v1100_v20 = vand.u32 4294901760, %v78_v11  ;;  %v1106_v29 = vand.u32 4294901760, %v51_v14 }
  0x13   :  { %479 = vmatpush.msrb.mxu3 %v954_v4  ;;  %v1084_v8 = vsub.f32 %v75_v60, %v1072_v2  ;;  %v1095_v13 = vsub.f32 %v48_v63, %v1078_v6  ;;  %v81_v36 = vsel %vm34_vm0, %v29_v27, 0  ;;  %v54_v40 = vsel %vm34_vm0, %v20_v35, 0 }
  0x14   :  { %701 = vmatpush.msrb.mxu1 %v954_v4  ;;  %v133_v4 = vand.u32 4294901760, %v1067_v62  ;;  %v206_v7 = vsub.f32 %v1056_v58, %v205_v1  ;;  %v1112_v34 = vsub.f32 %v78_v11, %v1100_v20  ;;  %v1123_v39 = vsub.f32 %v51_v14, %v1106_v29  ;;  %v31_v11 = vld [vmem:[%s1439_s0 + $0x88] sm:$0xff] }
  0x15   :  { %v213_v19 = vand.u32 4294901760, %v1084_v8  ;;  %v141_v26 = vand.u32 4294901760, %v1095_v13  ;;  %v1128_v45 = vand.u32 4294901760, %v81_v36  ;;  %v84_v59 = vsel %vm34_vm0, %v30_v49, 0 }
  0x16   :  { %192 = vmatmul.f32.gmra.mxu2 %v191_v50  ;;  %v134_v12 = vsub.f32 %v1067_v62, %v133_v4  ;;  %v207_v18 = vand.u32 4294901760, %v206_v7  ;;  %v221_v42 = vand.u32 4294901760, %v1112_v34  ;;  %v149_v47 = vand.u32 4294901760, %v1123_v39 }
  0x17   :  { %v214_v33 = vsub.f32 %v1084_v8, %v213_v19  ;;  %v142_v37 = vsub.f32 %v1095_v13, %v141_v26  ;;  %v1134_v50 = vand.u32 4294901760, %v54_v40  ;;  %v1140_v55 = vsub.f32 %v81_v36, %v1128_v45 }
  0x18   :  { %319 = vmatmul.f32.gmra.mxu3 %v977_v15  ;;  %120 = vmatmul.f32.gmra.mxu0 %v119_v53  ;;  %v135_v21 = vand.u32 4294901760, %v134_v12  ;;  %v222_v53 = vsub.f32 %v1112_v34, %v221_v42  ;;  %v150_v60 = vsub.f32 %v1123_v39, %v149_v47  ;;  %v57_v63 = vsel %vm34_vm0, %v21_v57, 0 }
  0x19   :  { %283 = vmatmul.f32.gmra.mxu1 %v995_v25  ;;  %v215_v41 = vand.u32 4294901760, %v214_v33  ;;  %v143_v46 = vand.u32 4294901760, %v142_v37  ;;  %v1151_v61 = vsub.f32 %v54_v40, %v1134_v50  ;;  %v1156_v5 = vand.u32 4294901760, %v84_v59 }
  0x1a   :  { %v151_v7 = vand.u32 4294901760, %v150_v60  ;;  %v1162_v12 = vand.u32 4294901760, %v57_v63  ;;  %v87_v27 = vsel %vm34_vm0, %v31_v11, 0 }
  0x1b   :  { %v157_v10 = vand.u32 4294901760, %v1151_v61 }
  0x1c   :  { %v1179_v35 = vsub.f32 %v57_v63, %v1162_v12 }
  0x1d   :  { %v158_v33 = vsub.f32 %v1151_v61, %v157_v10 }
  0x1e   :  { %200 = vmatmul.f32.gmra.mxu2 %v199_v0  ;;  %v223_v0 = vand.u32 4294901760, %v222_v53  ;;  %v165_v49 = vand.u32 4294901760, %v1179_v35 }
  0x20   :  { %323 = vmatmul.f32.gmra.mxu3 %v1002_v31  ;;  %128 = vmatmul.f32.gmra.mxu0 %v127_v3  ;;  %v229_v3 = vand.u32 4294901760, %v1140_v55  ;;  %v166_v60 = vsub.f32 %v1179_v35, %v165_v49 }
  0x21   :  { %287 = vmatmul.f32.gmra.mxu1 %v1024_v44 }
  0x22   :  { %v230_v14 = vsub.f32 %v1140_v55, %v229_v3  ;;  %v167_v11 = vand.u32 4294901760, %v166_v60 }
  0x24   :  { %v231_v37 = vand.u32 4294901760, %v230_v14 }
  0x26   :  { %208 = vmatmul.f32.gmra.mxu2 %v207_v18  ;;  %v1168_v18 = vsub.f32 %v84_v59, %v1156_v5 }
  0x28   :  { %327 = vmatmul.f32.gmra.mxu3 %v1042_v52  ;;  %136 = vmatmul.f32.gmra.mxu0 %v135_v21  ;;  %v22_v21 = vld [vmem:[%s1439_s0 + $0x40] sm:$0xff]  ;;  %v237_v40 = vand.u32 4294901760, %v1168_v18 }
  0x29   :  { %291 = vmatmul.f32.gmra.mxu1 %v1049_v56  ;;  %v60_v36 = vsel %vm34_vm0, %v22_v21, 0 }
  0x2a   :  { %v1187_v53 = vand.u32 4294901760, %v60_v36  ;;  %v238_v57 = vsub.f32 %v1168_v18, %v237_v40 }
  0x2c   :  { %v172_v63 = vsub.f32 %v60_v36, %v1187_v53 }
  0x2e   :  { %216 = vmatmul.f32.gmra.mxu2 %v215_v41  ;;  %v1184_v41 = vand.u32 4294901760, %v87_v27  ;;  %v173_v14 = vand.u32 4294901760, %v172_v63 }
  0x30   :  { %331 = vmatmul.f32.gmra.mxu3 %v1072_v2  ;;  %144 = vmatmul.f32.gmra.mxu0 %v143_v46  ;;  %v159_v46 = vand.u32 4294901760, %v158_v33  ;;  %v1193_v59 = vsub.f32 %v87_v27, %v1184_v41  ;;  %v174_v27 = vsub.f32 %v172_v63, %v173_v14 }
  0x31   :  { %295 = vmatmul.f32.gmra.mxu1 %v1078_v6 }
  0x32   :  { %v175_v36 = vand.u32 4294901760, %v174_v27 }
  0x36   :  { %224 = vmatmul.f32.gmra.mxu2 %v223_v0  ;;  %v239_v0 = vand.u32 4294901760, %v238_v57 }
  0x38   :  { %335 = vmatmul.f32.gmra.mxu3 %v1100_v20  ;;  %152 = vmatmul.f32.gmra.mxu0 %v151_v7  ;;  %v245_v7 = vand.u32 4294901760, %v1193_v59 }
  0x39   :  { %299 = vmatmul.f32.gmra.mxu1 %v1106_v29 }
  0x3a   :  { %v246_v21 = vsub.f32 %v1193_v59, %v245_v7 }
  0x3c   :  { %v247_v33 = vand.u32 4294901760, %v246_v21 }
  0x3e   :  { %232 = vmatmul.f32.gmra.mxu2 %v231_v37 }
  0x40   :  { %339 = vmatmul.f32.gmra.mxu3 %v1128_v45  ;;  %160 = vmatmul.f32.gmra.mxu0 %v159_v46 }
  0x41   :  { %303 = vmatmul.f32.gmra.mxu1 %v1134_v50 }
  0x46   :  { %240 = vmatmul.f32.gmra.mxu2 %v239_v0 }
  0x48   :  { %343 = vmatmul.f32.gmra.mxu3 %v1156_v5  ;;  %168 = vmatmul.f32.gmra.mxu0 %v167_v11 }
  0x49   :  { %307 = vmatmul.f32.gmra.mxu1 %v1162_v12 }
  0x4e   :  { %248 = vmatmul.f32.gmra.mxu2 %v247_v33 }
  0x50   :  { %347 = vmatmul.f32.gmra.mxu3 %v1184_v41  ;;  %176 = vmatmul.f32.gmra.mxu0 %v175_v36 }
  0x51   :  { %311 = vmatmul.f32.gmra.mxu1 %v1187_v53 }
  0x56   :  { %373 = vmatmul.f32.vlgmr.msrb.gmra.mxu2 %v992_v23 }
  0x58   :  { %483 = vmatmul.f32.vlgmr.msrb.gmra.mxu3 %v109_v28  ;;  %612 = vmatmul.f32.vlgmr.msrb.gmra.mxu0 %v979_v16 }
  0x59   :  { %703 = vmatmul.f32.vlgmr.msrb.gmra.mxu1 %v979_v16 }
  0x5e   :  { %378 = vmatmul.f32.gmra.mxu2 %v1005_v32 }
  0x60   :  { %489 = vmatmul.f32.gmra.mxu3 %v117_v38  ;;  %616 = vmatmul.f32.gmra.mxu0 %v995_v25 }
  0x61   :  { %707 = vmatmul.f32.gmra.mxu1 %v995_v25 }
  0x66   :  { %383 = vmatmul.f32.gmra.mxu2 %v1035_v48 }
  0x68   :  { %495 = vmatmul.f32.gmra.mxu3 %v125_v54  ;;  %620 = vmatmul.f32.gmra.mxu0 %v1024_v44 }
  0x69   :  { %711 = vmatmul.f32.gmra.mxu1 %v1024_v44 }
  0x6e   :  { %388 = vmatmul.f32.gmra.mxu2 %v1067_v62 }
  0x70   :  { %501 = vmatmul.f32.gmra.mxu3 %v133_v4  ;;  %624 = vmatmul.f32.gmra.mxu0 %v1049_v56 }
  0x71   :  { %715 = vmatmul.f32.gmra.mxu1 %v1049_v56 }
  0x76   :  { %393 = vmatmul.f32.gmra.mxu2 %v1095_v13 }
  0x78   :  { %507 = vmatmul.f32.gmra.mxu3 %v141_v26  ;;  %628 = vmatmul.f32.gmra.mxu0 %v1078_v6 }
  0x79   :  { %719 = vmatmul.f32.gmra.mxu1 %v1078_v6 }
  0x7e   :  { %398 = vmatmul.f32.gmra.mxu2 %v1123_v39 }
  0x80   :  { %513 = vmatmul.f32.gmra.mxu3 %v149_v47  ;;  %632 = vmatmul.f32.gmra.mxu0 %v1106_v29 }
  0x81   :  { %723 = vmatmul.f32.gmra.mxu1 %v1106_v29 }
  0x86   :  { %403 = vmatmul.f32.gmra.mxu2 %v1151_v61 }
  0x88   :  { %519 = vmatmul.f32.gmra.mxu3 %v157_v10  ;;  %636 = vmatmul.f32.gmra.mxu0 %v1134_v50 }
  0x89   :  { %727 = vmatmul.f32.gmra.mxu1 %v1134_v50 }
  0x8d   :  { %v113_v16 = vpop.f32.mrf.mxu0 }
  0x8e   :  { %408 = vmatmul.f32.gmra.mxu2 %v1179_v35  ;;  %v280_v23 = vpop.f32.mrf.mxu1 }
  0x8f   :  { %v1243_v25 = vadd.f32 %v280_v23, %v113_v16 }
  0x90   :  { %525 = vmatmul.f32.gmra.mxu3 %v165_v49  ;;  %640 = vmatmul.f32.gmra.mxu0 %v1162_v12 }
  0x91   :  { %v185_v28 = vpop.f32.mrf.mxu2  ;;  %731 = vmatmul.f32.gmra.mxu1 %v1162_v12 }
  0x93   :  { %v316_v32 = vpop.f32.mrf.mxu3 }
  0x94   :  { %v1247_v38 = vadd.f32 %v316_v32, %v185_v28 }
  0x95   :  { %v121_v44 = vpop.f32.mrf.mxu0 }
  0x96   :  { %413 = vmatmul.f32.gmra.mxu2 %v172_v63  ;;  %v284_v48 = vpop.f32.mrf.mxu1 }
  0x97   :  { %v1249_v54 = vadd.f32 %v284_v48, %v121_v44 }
  0x98   :  { %531 = vmatmul.f32.gmra.mxu3 %v173_v14  ;;  %644 = vmatmul.f32.gmra.mxu0 %v1187_v53 }
  0x99   :  { %v193_v56 = vpop.f32.mrf.mxu2  ;;  %735 = vmatmul.f32.gmra.mxu1 %v1187_v53 }
  0x9b   :  { %v320_v62 = vpop.f32.mrf.mxu3 }
  0x9c   :  { %v1253_v4 = vadd.f32 %v320_v62, %v193_v56 }
  0x9d   :  { %v129_v6 = vpop.f32.mrf.mxu0 }
  0x9e   :  { %418 = vmatmul.f32.gmra.mxu2 %v982_v17  ;;  %v288_v13 = vpop.f32.mrf.mxu1 }
  0x9f   :  { %v1256_v26 = vadd.f32 %v288_v13, %v129_v6 }
  0xa0   :  { %537 = vmatmul.f32.gmra.mxu3 %v181_v24  ;;  %648 = vmatmul.f32.gmra.mxu0 %v966_v9 }
  0xa1   :  { %v201_v29 = vpop.f32.mrf.mxu2  ;;  %739 = vmatmul.f32.gmra.mxu1 %v966_v9 }
  0xa3   :  { %v324_v39 = vpop.f32.mrf.mxu3 }
  0xa4   :  { %v1262_v47 = vadd.f32 %v324_v39, %v201_v29 }
  0xa5   :  { %v137_v50 = vpop.f32.mrf.mxu0 }
  0xa6   :  { %423 = vmatmul.f32.gmra.mxu2 %v988_v22  ;;  %v292_v61 = vpop.f32.mrf.mxu1 }
  0xa7   :  { %v1265_v10 = vadd.f32 %v292_v61, %v137_v50 }
  0xa8   :  { %543 = vmatmul.f32.gmra.mxu3 %v189_v30  ;;  %652 = vmatmul.f32.gmra.mxu0 %v977_v15 }
  0xa9   :  { %v209_v17 = vpop.f32.mrf.mxu2  ;;  %743 = vmatmul.f32.gmra.mxu1 %v977_v15 }
  0xab   :  { %v328_v24 = vpop.f32.mrf.mxu3 }
  0xac   :  { %v1271_v12 = vadd.f32 %v328_v24, %v209_v17 }
  0xad   :  { %v145_v9 = vpop.f32.mrf.mxu0 }
  0xae   :  { %428 = vmatmul.f32.gmra.mxu2 %v1022_v43  ;;  %v296_v35 = vpop.f32.mrf.mxu1 }
  0xaf   :  { %v1274_v37 = vadd.f32 %v296_v35, %v145_v9 }
  0xb0   :  { %549 = vmatmul.f32.gmra.mxu3 %v197_v51  ;;  %656 = vmatmul.f32.gmra.mxu0 %v1002_v31 }
  0xb1   :  { %v217_v22 = vpop.f32.mrf.mxu2  ;;  %747 = vmatmul.f32.gmra.mxu1 %v1002_v31 }
  0xb3   :  { %v332_v30 = vpop.f32.mrf.mxu3 }
  0xb4   :  { %v1280_v46 = vadd.f32 %v332_v30, %v217_v22 }
  0xb5   :  { %v153_v15 = vpop.f32.mrf.mxu0 }
  0xb6   :  { %433 = vmatmul.f32.gmra.mxu2 %v1056_v58  ;;  %v300_v49 = vpop.f32.mrf.mxu1 }
  0xb7   :  { %v1283_v53 = vadd.f32 %v300_v49, %v153_v15 }
  0xb8   :  { %555 = vmatmul.f32.gmra.mxu3 %v205_v1  ;;  %660 = vmatmul.f32.gmra.mxu0 %v1042_v52 }
  0xb9   :  { %v225_v43 = vpop.f32.mrf.mxu2  ;;  %751 = vmatmul.f32.gmra.mxu1 %v1042_v52 }
  0xbb   :  { %v336_v51 = vpop.f32.mrf.mxu3 }
  0xbc   :  { %v1289_v57 = vadd.f32 %v336_v51, %v225_v43 }
  0xbd   :  { %v161_v31 = vpop.f32.mrf.mxu0 }
  0xbe   :  { %438 = vmatmul.f32.gmra.mxu2 %v1084_v8  ;;  %v304_v60 = vpop.f32.mrf.mxu1 }
  0xbf   :  { %v1292_v63 = vadd.f32 %v304_v60, %v161_v31 }
  0xc0   :  { %561 = vmatmul.f32.gmra.mxu3 %v213_v19  ;;  %664 = vmatmul.f32.gmra.mxu0 %v1072_v2 }
  0xc1   :  { %v233_v58 = vpop.f32.mrf.mxu2  ;;  %755 = vmatmul.f32.gmra.mxu1 %v1072_v2 }
  0xc3   :  { %v340_v1 = vpop.f32.mrf.mxu3 }
  0xc4   :  { %v1298_v0 = vadd.f32 %v340_v1, %v233_v58 }
  0xc5   :  { %v169_v52 = vpop.f32.mrf.mxu0 }
  0xc6   :  { %443 = vmatmul.f32.gmra.mxu2 %v1112_v34  ;;  %v308_v11 = vpop.f32.mrf.mxu1 }
  0xc7   :  { %v1301_v14 = vadd.f32 %v308_v11, %v169_v52 }
  0xc8   :  { %567 = vmatmul.f32.gmra.mxu3 %v221_v42  ;;  %668 = vmatmul.f32.gmra.mxu0 %v1100_v20 }
  0xc9   :  { %v241_v8 = vpop.f32.mrf.mxu2  ;;  %759 = vmatmul.f32.gmra.mxu1 %v1100_v20 }
  0xcb   :  { %v344_v19 = vpop.f32.mrf.mxu3 }
  0xcc   :  { %v1307_v21 = vadd.f32 %v344_v19, %v241_v8 }
  0xcd   :  { %v177_v2 = vpop.f32.mrf.mxu0 }
  0xce   :  { %448 = vmatmul.f32.gmra.mxu2 %v1140_v55  ;;  %v312_v27 = vpop.f32.mrf.mxu1 }
  0xcf   :  { %v1310_v33 = vadd.f32 %v312_v27, %v177_v2 }
  0xd0   :  { %573 = vmatmul.f32.gmra.mxu3 %v229_v3  ;;  %672 = vmatmul.f32.gmra.mxu0 %v1128_v45 }
  0xd1   :  { %v249_v34 = vpop.f32.mrf.mxu2  ;;  %763 = vmatmul.f32.gmra.mxu1 %v1128_v45 }
  0xd3   :  { %v348_v42 = vpop.f32.mrf.mxu3 }
  0xd4   :  { %v1316_v36 = vadd.f32 %v348_v42, %v249_v34 }
  0xd5   :  { %v613_v20 = vpop.f32.mrf.mxu0 }
  0xd6   :  { %453 = vmatmul.f32.gmra.mxu2 %v1168_v18  ;;  %v704_v16 = vpop.f32.mrf.mxu1 }
  0xd8   :  { %579 = vmatmul.f32.gmra.mxu3 %v237_v40  ;;  %676 = vmatmul.f32.gmra.mxu0 %v1156_v5 }
  0xd9   :  { %v374_v23 = vpop.f32.mrf.mxu2  ;;  %767 = vmatmul.f32.gmra.mxu1 %v1156_v5 }
  0xda   :  { %v375_v55 = vadd.f32 %v374_v23, %v1243_v25 }
  0xdb   :  { %v484_v3 = vpop.f32.mrf.mxu3 }
  0xdc   :  { %v485_v28 = vadd.f32 %v484_v3, %v375_v55 }
  0xdd   :  { %v617_v45 = vpop.f32.mrf.mxu0 }
  0xde   :  { %v614_v32 = vadd.f32 %v613_v20, %v485_v28  ;;  %458 = vmatmul.f32.gmra.mxu2 %v1193_v59  ;;  %v708_v44 = vpop.f32.mrf.mxu1 }
  0xe0   :  { %v705_v48 = vadd.f32 %v704_v16, %v614_v32  ;;  %585 = vmatmul.f32.gmra.mxu3 %v245_v7  ;;  %680 = vmatmul.f32.gmra.mxu0 %v1184_v41 }
  0xe1   :  { %v379_v18 = vpop.f32.mrf.mxu2  ;;  %771 = vmatmul.f32.gmra.mxu1 %v1184_v41 }
  0xe2   :  { %775 = vst.msk [vmem:[%s1441_s2] sm:$0xff] %vm34_vm0, %v705_v48  ;;  %v869_v5 = vadd.f32 -127.0, %v705_v48  ;;  %v380_v40 = vadd.f32 %v379_v18, %v1249_v54 }
  0xe3   :  { %v490_v25 = vpop.f32.mrf.mxu3 }
  0xe4   :  { %v811_v56 = vmul.f32 0.007874016, %v869_v5  ;;  %v491_v62 = vadd.f32 %v490_v25, %v380_v40 }
  0xe5   :  { %v621_v6 = vpop.f32.mrf.mxu0 }
  0xe6   :  { %829 = vst.msk [vmem:[#allocation2] sm:$0xff] %vm34_vm0, %v811_v56  ;;  %v618_v59 = vadd.f32 %v617_v45, %v491_v62  ;;  %v712_v7 = vpop.f32.mrf.mxu1 }
  0xe8   :  { %v709_v13 = vadd.f32 %v708_v44, %v618_v59 }
  0xe9   :  { %v384_v29 = vpop.f32.mrf.mxu2 }
  0xea   :  { %776 = vst.msk [vmem:[%s1441_s2 + $0x8] sm:$0xff] %vm34_vm0, %v709_v13  ;;  %v870_v41 = vadd.f32 -127.0, %v709_v13  ;;  %v385_v39 = vadd.f32 %v384_v29, %v1256_v26 }
  0xeb   :  { %v496_v50 = vpop.f32.mrf.mxu3 }
  0xec   :  { %v812_v54 = vmul.f32 0.007874016, %v870_v41  ;;  %v497_v61 = vadd.f32 %v496_v50, %v385_v39 }
  0xed   :  { %v625_v17 = vpop.f32.mrf.mxu0 }
  0xee   :  { %830 = vst.msk [vmem:[#allocation2 + $0x8] sm:$0xff] %vm34_vm0, %v812_v54  ;;  %v622_v24 = vadd.f32 %v621_v6, %v497_v61  ;;  %v716_v9 = vpop.f32.mrf.mxu1 }
  0xf0   :  { %v713_v35 = vadd.f32 %v712_v7, %v622_v24 }
  0xf1   :  { %v389_v22 = vpop.f32.mrf.mxu2 }
  0xf2   :  { %777 = vst.msk [vmem:[%s1441_s2 + $0x10] sm:$0xff] %vm34_vm0, %v713_v35  ;;  %v871_v30 = vadd.f32 -127.0, %v713_v35  ;;  %v390_v15 = vadd.f32 %v389_v22, %v1265_v10 }
  0xf3   :  { %v502_v49 = vpop.f32.mrf.mxu3 }
  0xf4   :  { %v813_v26 = vmul.f32 0.007874016, %v871_v30  ;;  %v503_v43 = vadd.f32 %v502_v49, %v390_v15 }
  0xf5   :  { %v629_v51 = vpop.f32.mrf.mxu0 }
  0xf6   :  { %831 = vst.msk [vmem:[#allocation2 + $0x10] sm:$0xff] %vm34_vm0, %v813_v26  ;;  %v626_v31 = vadd.f32 %v625_v17, %v503_v43  ;;  %v720_v60 = vpop.f32.mrf.mxu1 }
  0xf8   :  { %v717_v58 = vadd.f32 %v716_v9, %v626_v31 }
  0xf9   :  { %v394_v1 = vpop.f32.mrf.mxu2 }
  0xfa   :  { %778 = vst.msk [vmem:[%s1441_s2 + $0x18] sm:$0xff] %vm34_vm0, %v717_v58  ;;  %v872_v52 = vadd.f32 -127.0, %v717_v58  ;;  %v395_v11 = vadd.f32 %v394_v1, %v1274_v37 }
  0xfb   :  { %v508_v8 = vpop.f32.mrf.mxu3 }
  0xfc   :  { %v814_v10 = vmul.f32 0.007874016, %v872_v52  ;;  %v509_v19 = vadd.f32 %v508_v8, %v395_v11 }
  0xfd   :  { %v633_v2 = vpop.f32.mrf.mxu0 }
  0xfe   :  { %832 = vst.msk [vmem:[#allocation2 + $0x18] sm:$0xff] %vm34_vm0, %v814_v10  ;;  %v630_v27 = vadd.f32 %v629_v51, %v509_v19  ;;  %v724_v34 = vpop.f32.mrf.mxu1 }
 0x100   :  { %v721_v42 = vadd.f32 %v720_v60, %v630_v27 }
 0x101   :  { %v399_v20 = vpop.f32.mrf.mxu2 }
 0x102   :  { %779 = vst.msk [vmem:[%s1441_s2 + $0x20] sm:$0xff] %vm34_vm0, %v721_v42  ;;  %v873_v16 = vadd.f32 -127.0, %v721_v42  ;;  %v400_v23 = vadd.f32 %v399_v20, %v1283_v53 }
 0x103   :  { %v514_v55 = vpop.f32.mrf.mxu3 }
 0x104   :  { %v815_v37 = vmul.f32 0.007874016, %v873_v16  ;;  %v515_v3 = vadd.f32 %v514_v55, %v400_v23 }
 0x105   :  { %v637_v28 = vpop.f32.mrf.mxu0 }
 0x106   :  { %833 = vst.msk [vmem:[#allocation2 + $0x20] sm:$0xff] %vm34_vm0, %v815_v37  ;;  %v634_v45 = vadd.f32 %v633_v2, %v515_v3  ;;  %v728_v32 = vpop.f32.mrf.mxu1 }
 0x108   :  { %v725_v44 = vadd.f32 %v724_v34, %v634_v45 }
 0x109   :  { %v404_v48 = vpop.f32.mrf.mxu2 }
 0x10a   :  { %780 = vst.msk [vmem:[%s1441_s2 + $0x28] sm:$0xff] %vm34_vm0, %v725_v44  ;;  %v874_v18 = vadd.f32 -127.0, %v725_v44  ;;  %v405_v5 = vadd.f32 %v404_v48, %v1292_v63 }
 0x10b   :  { %v520_v40 = vpop.f32.mrf.mxu3 }
 0x10c   :  { %v816_v53 = vmul.f32 0.007874016, %v874_v18  ;;  %v521_v25 = vadd.f32 %v520_v40, %v405_v5 }
 0x10d   :  { %v641_v56 = vpop.f32.mrf.mxu0 }
 0x10e   :  { %834 = vst.msk [vmem:[#allocation2 + $0x28] sm:$0xff] %vm34_vm0, %v816_v53  ;;  %v638_v62 = vadd.f32 %v637_v28, %v521_v25  ;;  %v732_v6 = vpop.f32.mrf.mxu1 }
 0x110   :  { %v729_v59 = vadd.f32 %v728_v32, %v638_v62 }
 0x111   :  { %v409_v7 = vpop.f32.mrf.mxu2 }
 0x112   :  { %781 = vst.msk [vmem:[%s1441_s2 + $0x30] sm:$0xff] %vm34_vm0, %v729_v59  ;;  %v875_v13 = vadd.f32 -127.0, %v729_v59  ;;  %v410_v29 = vadd.f32 %v409_v7, %v1301_v14 }
 0x113   :  { %v526_v41 = vpop.f32.mrf.mxu3 }
 0x114   :  { %v817_v63 = vmul.f32 0.007874016, %v875_v13  ;;  %v527_v39 = vadd.f32 %v526_v41, %v410_v29 }
 0x115   :  { %v645_v50 = vpop.f32.mrf.mxu0 }
 0x116   :  { %835 = vst.msk [vmem:[#allocation2 + $0x30] sm:$0xff] %vm34_vm0, %v817_v63  ;;  %v642_v54 = vadd.f32 %v641_v56, %v527_v39  ;;  %v736_v61 = vpop.f32.mrf.mxu1 }
 0x118   :  { %v733_v17 = vadd.f32 %v732_v6, %v642_v54 }
 0x119   :  { %v414_v24 = vpop.f32.mrf.mxu2 }
 0x11a   :  { %782 = vst.msk [vmem:[%s1441_s2 + $0x38] sm:$0xff] %vm34_vm0, %v733_v17  ;;  %v876_v9 = vadd.f32 -127.0, %v733_v17  ;;  %v415_v35 = vadd.f32 %v414_v24, %v1310_v33 }
 0x11b   :  { %v532_v22 = vpop.f32.mrf.mxu3 }
 0x11c   :  { %v818_v14 = vmul.f32 0.007874016, %v876_v9  ;;  %v533_v30 = vadd.f32 %v532_v22, %v415_v35 }
 0x11d   :  { %v649_v15 = vpop.f32.mrf.mxu0 }
 0x11e   :  { %836 = vst.msk [vmem:[#allocation2 + $0x38] sm:$0xff] %vm34_vm0, %v818_v14  ;;  %v646_v49 = vadd.f32 %v645_v50, %v533_v30  ;;  %v740_v26 = vpop.f32.mrf.mxu1 }
 0x120   :  { %v737_v43 = vadd.f32 %v736_v61, %v646_v49 }
 0x121   :  { %v419_v51 = vpop.f32.mrf.mxu2 }
 0x122   :  { %783 = vst.msk [vmem:[%s1441_s2 + $0x40] sm:$0xff] %vm34_vm0, %v737_v43  ;;  %v877_v31 = vadd.f32 -127.0, %v737_v43  ;;  %v420_v60 = vadd.f32 %v419_v51, %v1247_v38 }
 0x123   :  { %v538_v58 = vpop.f32.mrf.mxu3 }
 0x124   :  { %v819_v33 = vmul.f32 0.007874016, %v877_v31  ;;  %v539_v1 = vadd.f32 %v538_v58, %v420_v60 }
 0x125   :  { %v653_v52 = vpop.f32.mrf.mxu0 }
 0x126   :  { %837 = vst.msk [vmem:[#allocation2 + $0x40] sm:$0xff] %vm34_vm0, %v819_v33  ;;  %v650_v11 = vadd.f32 %v649_v15, %v539_v1  ;;  %v744_v8 = vpop.f32.mrf.mxu1 }
 0x128   :  { %v741_v10 = vadd.f32 %v740_v26, %v650_v11 }
 0x129   :  { %v424_v19 = vpop.f32.mrf.mxu2 }
 0x12a   :  { %784 = vst.msk [vmem:[%s1441_s2 + $0x48] sm:$0xff] %vm34_vm0, %v741_v10  ;;  %v878_v2 = vadd.f32 -127.0, %v741_v10  ;;  %v425_v27 = vadd.f32 %v424_v19, %v1253_v4 }
 0x12b   :  { %v544_v34 = vpop.f32.mrf.mxu3 }
 0x12c   :  { %v820_v38 = vmul.f32 0.007874016, %v878_v2  ;;  %v545_v42 = vadd.f32 %v544_v34, %v425_v27 }
 0x12d   :  { %v657_v20 = vpop.f32.mrf.mxu0 }
 0x12e   :  { %838 = vst.msk [vmem:[#allocation2 + $0x48] sm:$0xff] %vm34_vm0, %v820_v38  ;;  %v654_v16 = vadd.f32 %v653_v52, %v545_v42  ;;  %v748_v23 = vpop.f32.mrf.mxu1 }
 0x130   :  { %v745_v55 = vadd.f32 %v744_v8, %v654_v16 }
 0x131   :  { %v429_v37 = vpop.f32.mrf.mxu2 }
 0x132   :  { %785 = vst.msk [vmem:[%s1441_s2 + $0x50] sm:$0xff] %vm34_vm0, %v745_v55  ;;  %v879_v3 = vadd.f32 -127.0, %v745_v55  ;;  %v430_v28 = vadd.f32 %v429_v37, %v1262_v47 }
 0x133   :  { %v550_v45 = vpop.f32.mrf.mxu3 }
 0x134   :  { %v821_v4 = vmul.f32 0.007874016, %v879_v3  ;;  %v551_v32 = vadd.f32 %v550_v45, %v430_v28 }
 0x135   :  { %v661_v44 = vpop.f32.mrf.mxu0 }
 0x136   :  { %839 = vst.msk [vmem:[#allocation2 + $0x50] sm:$0xff] %vm34_vm0, %v821_v4  ;;  %v658_v48 = vadd.f32 %v657_v20, %v551_v32  ;;  %v752_v18 = vpop.f32.mrf.mxu1 }
 0x138   :  { %v749_v5 = vadd.f32 %v748_v23, %v658_v48 }
 0x139   :  { %v434_v40 = vpop.f32.mrf.mxu2 }
 0x13a   :  { %786 = vst.msk [vmem:[%s1441_s2 + $0x58] sm:$0xff] %vm34_vm0, %v749_v5  ;;  %v880_v53 = vadd.f32 -127.0, %v749_v5  ;;  %v435_v25 = vadd.f32 %v434_v40, %v1271_v12 }
 0x13b   :  { %v556_v56 = vpop.f32.mrf.mxu3 }
 0x13c   :  { %v822_v47 = vmul.f32 0.007874016, %v880_v53  ;;  %v557_v62 = vadd.f32 %v556_v56, %v435_v25 }
 0x13d   :  { %v665_v6 = vpop.f32.mrf.mxu0 }
 0x13e   :  { %840 = vst.msk [vmem:[#allocation2 + $0x58] sm:$0xff] %vm34_vm0, %v822_v47  ;;  %v662_v59 = vadd.f32 %v661_v44, %v557_v62  ;;  %v756_v7 = vpop.f32.mrf.mxu1 }
 0x140   :  { %v753_v13 = vadd.f32 %v752_v18, %v662_v59 }
 0x141   :  { %v439_v29 = vpop.f32.mrf.mxu2 }
 0x142   :  { %787 = vst.msk [vmem:[%s1441_s2 + $0x60] sm:$0xff] %vm34_vm0, %v753_v13  ;;  %v881_v41 = vadd.f32 -127.0, %v753_v13  ;;  %v440_v63 = vadd.f32 %v439_v29, %v1280_v46 }
 0x143   :  { %v562_v39 = vpop.f32.mrf.mxu3 }
 0x144   :  { %v823_v12 = vmul.f32 0.007874016, %v881_v41  ;;  %v563_v50 = vadd.f32 %v562_v39, %v440_v63 }
 0x145   :  { %v669_v54 = vpop.f32.mrf.mxu0 }
 0x146   :  { %841 = vst.msk [vmem:[#allocation2 + $0x60] sm:$0xff] %vm34_vm0, %v823_v12  ;;  %v666_v61 = vadd.f32 %v665_v6, %v563_v50  ;;  %v760_v17 = vpop.f32.mrf.mxu1 }
 0x148   :  { %v757_v24 = vadd.f32 %v756_v7, %v666_v61 }
 0x149   :  { %v444_v9 = vpop.f32.mrf.mxu2 }
 0x14a   :  { %788 = vst.msk [vmem:[%s1441_s2 + $0x68] sm:$0xff] %vm34_vm0, %v757_v24  ;;  %v882_v35 = vadd.f32 -127.0, %v757_v24  ;;  %v445_v22 = vadd.f32 %v444_v9, %v1289_v57 }
 0x14b   :  { %v568_v14 = vpop.f32.mrf.mxu3 }
 0x14c   :  { %v824_v46 = vmul.f32 0.007874016, %v882_v35  ;;  %v569_v30 = vadd.f32 %v568_v14, %v445_v22 }
 0x14d   :  { %v673_v49 = vpop.f32.mrf.mxu0 }
 0x14e   :  { %842 = vst.msk [vmem:[#allocation2 + $0x68] sm:$0xff] %vm34_vm0, %v824_v46  ;;  %v670_v15 = vadd.f32 %v669_v54, %v569_v30  ;;  %v764_v51 = vpop.f32.mrf.mxu1 }
 0x150   :  { %v761_v26 = vadd.f32 %v760_v17, %v670_v15 }
 0x151   :  { %v449_v43 = vpop.f32.mrf.mxu2 }
 0x152   :  { %789 = vst.msk [vmem:[%s1441_s2 + $0x70] sm:$0xff] %vm34_vm0, %v761_v26  ;;  %v883_v31 = vadd.f32 -127.0, %v761_v26  ;;  %v450_v60 = vadd.f32 %v449_v43, %v1298_v0 }
 0x153   :  { %v574_v58 = vpop.f32.mrf.mxu3 }
 0x154   :  { %v825_v57 = vmul.f32 0.007874016, %v883_v31  ;;  %v575_v33 = vadd.f32 %v574_v58, %v450_v60 }
 0x155   :  { %v677_v8 = vpop.f32.mrf.mxu0 }
 0x156   :  { %843 = vst.msk [vmem:[#allocation2 + $0x70] sm:$0xff] %vm34_vm0, %v825_v57  ;;  %v674_v1 = vadd.f32 %v673_v49, %v575_v33  ;;  %v768_v27 = vpop.f32.mrf.mxu1 }
 0x158   :  { %v765_v52 = vadd.f32 %v764_v51, %v674_v1 }
 0x159   :  { %v454_v11 = vpop.f32.mrf.mxu2 }
 0x15a   :  { %790 = vst.msk [vmem:[%s1441_s2 + $0x78] sm:$0xff] %vm34_vm0, %v765_v52  ;;  %v884_v10 = vadd.f32 -127.0, %v765_v52  ;;  %v455_v19 = vadd.f32 %v454_v11, %v1307_v21 }
 0x15b   :  { %v580_v2 = vpop.f32.mrf.mxu3 }
 0x15c   :  { %v826_v0 = vmul.f32 0.007874016, %v884_v10  ;;  %v581_v34 = vadd.f32 %v580_v2, %v455_v19 }
 0x15d   :  { %v681_v37 = vpop.f32.mrf.mxu0 }
 0x15e   :  { %844 = vst.msk [vmem:[#allocation2 + $0x78] sm:$0xff] %vm34_vm0, %v826_v0  ;;  %v678_v38 = vadd.f32 %v677_v8, %v581_v34  ;;  %v772_v28 = vpop.f32.mrf.mxu1 }
 0x160   :  { %v769_v42 = vadd.f32 %v768_v27, %v678_v38 }
 0x161   :  { %v459_v20 = vpop.f32.mrf.mxu2 }
 0x162   :  { %791 = vst.msk [vmem:[%s1441_s2 + $0x80] sm:$0xff] %vm34_vm0, %v769_v42  ;;  %v885_v16 = vadd.f32 -127.0, %v769_v42  ;;  %v460_v23 = vadd.f32 %v459_v20, %v1316_v36 }
 0x163   :  { %v586_v55 = vpop.f32.mrf.mxu3 }
 0x164   :  { %v827_v21 = vmul.f32 0.007874016, %v885_v16  ;;  %v587_v3 = vadd.f32 %v586_v55, %v460_v23 }
 0x166   :  { %845 = vst.msk [vmem:[#allocation2 + $0x80] sm:$0xff] %vm34_vm0, %v827_v21  ;;  %v682_v45 = vadd.f32 %v681_v37, %v587_v3 }
 0x168   :  { %v773_v4 = vadd.f32 %v772_v28, %v682_v45 }
 0x16a   :  { %792 = vst.msk [vmem:[%s1441_s2 + $0x88] sm:$0xff] %vm34_vm0, %v773_v4  ;;  %v886_v36 = vadd.f32 -127.0, %v773_v4 }
 0x16c   :  { %v828_v32 = vmul.f32 0.007874016, %v886_v36 }
 0x16e   :  { %846 = vst.msk [vmem:[#allocation2 + $0x88] sm:$0xff] %vm34_vm0, %v828_v32 }
 0x16f   :  { %861 = dma.vmem_to_hbm [thread:$0]  %s854_s28, 2304, %s856_s4, [#allocation3], %s921_s7, %s921_s7, %s922_s8  }
 0x170   :  { %918 = dma.done.wait [#allocation3], 2304  }
 0x171   :  { %919 = vsyncadd [#allocation3], 4294964992 }
 0x172   :  { %868 = vsyncpa [#allocation3], 1 }

</bundles_post_ra>
